<compile_context>
chip_gen: v7x
topology: tpu7x:2x2x1
jax: 0.10.0
libtpu: 0.0.40
codegen_flags: <defaults>
</compile_context>

<pallas_src>
import jax
import jax.numpy as jnp
from jax.experimental import pallas as pl
from jax.experimental.pallas import tpu as pltpu

# ---- model config (matches DQN defaults for the HIV env) ----
INPUT_DIM = 6      # env.observation_space.shape[0] for HIVPatient
HIDDEN_DIM = 256
OUTPUT_DIM = 4     # env.action_space.n for HIVPatient
DEPTH = 6          # -> 1 input layer + (DEPTH-1)=5 hidden layers + 1 output layer

LANE = 128
SUBLANE = 8


def _round_up(x, m):
    return ((x + m - 1) // m) * m


IN_PAD = _round_up(INPUT_DIM, SUBLANE)   # 8  (pad only to sublane, not 128)
OUT_PAD = _round_up(OUTPUT_DIM, LANE)    # 128 (keep the MXU output lane-dense in-kernel)


def dqn_kernel(x_ref, w_in_ref, b_in_ref, w_h_ref, b_h_ref, w_out_ref, b_out_ref,
               o_ref):
    tb = x_ref.shape[0]
    n_hidden = w_h_ref.shape[0]

    # Split the batch tile into independent sub-tiles so one sub-tile's
    # bias+ReLU+cast epilogue overlaps the next sub-tile's matmul (MXU vs VPU
    # slots), and live-activation vreg pressure is halved.
    n_chunks = 2 if (tb >= 256 and tb % 16 == 0) else 1
    rows = tb // n_chunks

    w_in = w_in_ref[...]
    b_in = b_in_ref[...]
    w_out = w_out_ref[...]
    b_out = b_out_ref[...]

    # input layer + ReLU (bf16 dot operands, f32 accumulate / bias / ReLU,
    # then activation stored as bf16 for the next layer)
    hs = []
    for c in range(n_chunks):
        xc = x_ref[pl.ds(c * rows, rows), :].astype(jnp.bfloat16)
        acc = jnp.dot(xc, w_in, preferred_element_type=jnp.float32)
        hs.append(jnp.maximum(acc + b_in, 0.0).astype(jnp.bfloat16))

    # hidden layers (static unroll over the stacked weight tensor)
    for i in range(n_hidden):
        w = w_h_ref[i]
        b = b_h_ref[i]
        hs = [
            jnp.maximum(
                jnp.dot(h, w, preferred_element_type=jnp.float32) + b, 0.0
            ).astype(jnp.bfloat16)
            for h in hs
        ]

    # output layer (no activation); write only the 4 real Q-value lanes (exact
    # f32) into the un-padded output block.
    for c in range(n_chunks):
        acc = jnp.dot(hs[c], w_out, preferred_element_type=jnp.float32) + b_out
        o_ref[pl.ds(c * rows, rows), :] = acc[:, :OUTPUT_DIM].astype(o_ref.dtype)


def dqn_forward(x, params, tb=512):
    """x: (B, INPUT_DIM) float32 -> (B, OUTPUT_DIM) float32.

    tb: batch tile; >=256 fills the 256-wide MXU on v6e/v7x. The tile is capped
    so that big batches always give >= 2 grid steps (v7x megacore sharding).
    VMEM footprint stays ~2-3 MB, far under every generation's limit.
    """
    w_in, b_in, w_h, b_h, w_out, b_out = params
    n_hidden = w_h.shape[0]

    B = x.shape[0]
    B_su = _round_up(max(B, 1), SUBLANE)

    TB = min(tb, B_su)
    # v7x: the "parallel" batch axis only shards across the 2 TensorCores if the
    # grid has >= 2 steps; cap TB for big batches while keeping each step MXU-full.
    if B_su >= 512:
        TB = min(TB, _round_up(B_su // 2, 16))
    TB = _round_up(TB, SUBLANE)
    B_pad = _round_up(B_su, TB)

    # zero-pad batch (to a multiple of TB) and input features (to 8)
    x_pad = jnp.zeros((B_pad, IN_PAD), jnp.float32).at[:B, :INPUT_DIM].set(x)

    flops = 2 * B_pad * (IN_PAD * HIDDEN_DIM
                         + n_hidden * HIDDEN_DIM * HIDDEN_DIM
                         + HIDDEN_DIM * OUT_PAD)
    weight_bytes = (w_in.size + w_h.size + w_out.size) * 2 \
        + (b_in.size + b_h.size + b_out.size) * 4
    bytes_accessed = weight_bytes + x_pad.size * 4 + B_pad * OUTPUT_DIM * 4

    grid_spec = pltpu.PrefetchScalarGridSpec(
        num_scalar_prefetch=0,
        grid=(B_pad // TB,),
        in_specs=[
            # batch-tiled input
            pl.BlockSpec((TB, IN_PAD), lambda i: (i, 0)),
            # weights/biases: constant index_map -> fetched once, VMEM-resident
            # across grid steps.
            # TODO(synk): pipeline_mode=pl.Buffered(1) would drop the dead 2nd
            # buffer (~0.7 MB); left at default double-buffering for portability.
            pl.BlockSpec((IN_PAD, HIDDEN_DIM), lambda i: (0, 0)),
            pl.BlockSpec((1, HIDDEN_DIM), lambda i: (0, 0)),
            pl.BlockSpec((n_hidden, HIDDEN_DIM, HIDDEN_DIM), lambda i: (0, 0, 0)),
            pl.BlockSpec((n_hidden, 1, HIDDEN_DIM), lambda i: (0, 0, 0)),
            pl.BlockSpec((HIDDEN_DIM, OUT_PAD), lambda i: (0, 0)),
            pl.BlockSpec((1, OUT_PAD), lambda i: (0, 0)),
        ],
        # un-padded output: block last dim equals full array dim (4), legal.
        out_specs=pl.BlockSpec((TB, OUTPUT_DIM), lambda i: (i, 0)),
    )

    out = pl.pallas_call(
        dqn_kernel,
        out_shape=jax.ShapeDtypeStruct((B_pad, OUTPUT_DIM), jnp.float32),
        grid_spec=grid_spec,
        compiler_params=pltpu.CompilerParams(
            dimension_semantics=("parallel",)),
        cost_estimate=pl.CostEstimate(
            flops=int(flops), transcendentals=0,
            bytes_accessed=int(bytes_accessed)),
    )(x_pad, w_in, b_in, w_h, b_h, w_out, b_out)

    # TODO(synk): the B<=8 act() path is launch/weight-DMA latency bound; batch
    # multiple env states per call (vectorized envs) to amortize it.
    return out[:B]


def init_params(key):
    """Deterministic init mimicking torch.nn.Linear (U(-1/sqrt(fan_in), 1/sqrt(fan_in))).

    Weights are padded and cast to bfloat16; biases stay float32.
    """
    ks = jax.random.split(key, 8)

    def linear(kw, kb, fan_in, fan_out):
        bound = 1.0 / jnp.sqrt(jnp.float32(fan_in))
        w = jax.random.uniform(kw, (fan_in, fan_out), jnp.float32, -bound, bound)
        b = jax.random.uniform(kb, (1, fan_out), jnp.float32, -bound, bound)
        return w, b

    # input layer (pad input-feature rows with zeros up to IN_PAD=8)
    w_in_raw, b_in = linear(ks[0], ks[1], INPUT_DIM, HIDDEN_DIM)
    w_in = jnp.zeros((IN_PAD, HIDDEN_DIM), jnp.float32).at[:INPUT_DIM, :].set(w_in_raw)

    # hidden layers, stacked
    hk = jax.random.split(ks[2], 2 * (DEPTH - 1))
    w_h_list, b_h_list = [], []
    for i in range(DEPTH - 1):
        w, b = linear(hk[2 * i], hk[2 * i + 1], HIDDEN_DIM, HIDDEN_DIM)
        w_h_list.append(w)
        b_h_list.append(b)
    w_h = jnp.stack(w_h_list)              # (DEPTH-1, H, H)
    b_h = jnp.stack(b_h_list)              # (DEPTH-1, 1, H)

    # output layer (pad output columns with zeros up to OUT_PAD=128 for a
    # lane-dense MXU result; only the first 4 lanes are stored by the kernel)
    w_out_raw, b_out_raw = linear(ks[3], ks[4], HIDDEN_DIM, OUTPUT_DIM)
    w_out = jnp.zeros((HIDDEN_DIM, OUT_PAD), jnp.float32).at[:, :OUTPUT_DIM].set(w_out_raw)
    b_out = jnp.zeros((1, OUT_PAD), jnp.float32).at[:, :OUTPUT_DIM].set(b_out_raw)

    params = (w_in.astype(jnp.bfloat16), b_in,
              w_h.astype(jnp.bfloat16), b_h,
              w_out.astype(jnp.bfloat16), b_out)
    return params


def reference_forward(x, params):
    """Plain-JAX reference with identical numerics (bf16 weights/activations at the
    dot operands, f32 accumulation, f32 output)."""
    w_in, b_in, w_h, b_h, w_out, b_out = params

    def dense(h, w, b):
        return jnp.dot(h.astype(jnp.bfloat16), w,
                       preferred_element_type=jnp.float32) + b

    xp = jnp.zeros((x.shape[0], IN_PAD), jnp.float32).at[:, :INPUT_DIM].set(x)
    h = jnp.maximum(dense(xp, w_in, b_in), 0.0)
    for i in range(w_h.shape[0]):
        h = jnp.maximum(dense(h, w_h[i], b_h[i]), 0.0)
    out = dense(h, w_out, b_out)
    return out[:, :OUTPUT_DIM]


if __name__ == "__main__":
    key = jax.random.PRNGKey(0)
    pkey, xkey1, xkey2, xkey3 = jax.random.split(key, 4)

    params = init_params(pkey)

    # small "act()" style batch (grid of 1, single sub-tile)
    B1 = 8
    x1 = jax.random.normal(xkey1, (B1, INPUT_DIM), jnp.float32)
    out1 = jax.block_until_ready(dqn_forward(x1, params))
    ref1 = reference_forward(x1, params)
    assert out1.shape == (B1, OUTPUT_DIM)
    assert jnp.allclose(out1, ref1, atol=1e-3, rtol=1e-3), "mismatch vs reference (B=8)"

    # batch exercising the batch grid (TB=16 -> 3 grid steps)
    B2 = 48
    x2 = jax.random.normal(xkey2, (B2, INPUT_DIM), jnp.float32)
    out2 = jax.block_until_ready(dqn_forward(x2, params, tb=16))
    ref2 = reference_forward(x2, params)
    assert out2.shape == (B2, OUTPUT_DIM)
    assert jnp.allclose(out2, ref2, atol=1e-3, rtol=1e-3), "mismatch vs reference (B=48)"

    # large batch exercising the 2-grid-step (megacore) + 2-sub-tile path
    B3 = 512
    x3 = jax.random.normal(xkey3, (B3, INPUT_DIM), jnp.float32)
    out3 = jax.block_until_ready(dqn_forward(x3, params))
    ref3 = reference_forward(x3, params)
    assert out3.shape == (B3, OUTPUT_DIM)
    assert jnp.allclose(out3, ref3, atol=1e-3, rtol=1e-3), "mismatch vs reference (B=512)"

    print("KERNEL_OK")
</pallas_src>

<mosaic_0001>
module attributes {stable_mosaic.version = 11 : i64} {
  func.func @dqn_kernel(%arg0: i32, %arg1: memref<8x8xf32, #tpu.memory_space<vmem>>, %arg2: memref<8x256xbf16, #tpu.memory_space<vmem>>, %arg3: memref<1x256xf32, #tpu.memory_space<vmem>>, %arg4: memref<5x256x256xbf16, #tpu.memory_space<vmem>>, %arg5: memref<5x1x256xf32, #tpu.memory_space<vmem>>, %arg6: memref<256x128xbf16, #tpu.memory_space<vmem>>, %arg7: memref<1x128xf32, #tpu.memory_space<vmem>>, %arg8: memref<8x4xf32, #tpu.memory_space<vmem>>) attributes {dimension_semantics = [#tpu.dimension_semantics<parallel>], iteration_bounds = array<i64: 1>, scalar_prefetch = 0 : i64, scratch_operands = 0 : i64, tpu.core_type = #tpu.core_type<tc>, window_params = [{transform_indices = @transform_0, window_bounds = array<i64: 8, 8>}, {pipeline_mode = #tpu.pipeline_mode<synchronous>, transform_indices = @transform_1, window_bounds = array<i64: 8, 256>}, {pipeline_mode = #tpu.pipeline_mode<synchronous>, transform_indices = @transform_2, window_bounds = array<i64: 1, 256>}, {pipeline_mode = #tpu.pipeline_mode<synchronous>, transform_indices = @transform_3, window_bounds = array<i64: 5, 256, 256>}, {pipeline_mode = #tpu.pipeline_mode<synchronous>, transform_indices = @transform_4, window_bounds = array<i64: 5, 1, 256>}, {pipeline_mode = #tpu.pipeline_mode<synchronous>, transform_indices = @transform_5, window_bounds = array<i64: 256, 128>}, {pipeline_mode = #tpu.pipeline_mode<synchronous>, transform_indices = @transform_6, window_bounds = array<i64: 1, 128>}, {transform_indices = @transform_7, window_bounds = array<i64: 8, 4>}]} {
    %c0 = arith.constant 0 : index
    %c0_0 = arith.constant 0 : index
    %0 = vector.load %arg2[%c0, %c0_0] : memref<8x256xbf16, #tpu.memory_space<vmem>>, vector<8x256xbf16>
    %c0_1 = arith.constant 0 : index
    %c0_2 = arith.constant 0 : index
    %1 = vector.load %arg3[%c0_1, %c0_2] : memref<1x256xf32, #tpu.memory_space<vmem>>, vector<1x256xf32>
    %c0_3 = arith.constant 0 : index
    %c0_4 = arith.constant 0 : index
    %2 = vector.load %arg6[%c0_3, %c0_4] : memref<256x128xbf16, #tpu.memory_space<vmem>>, vector<256x128xbf16>
    %c0_5 = arith.constant 0 : index
    %c0_6 = arith.constant 0 : index
    %3 = vector.load %arg7[%c0_5, %c0_6] : memref<1x128xf32, #tpu.memory_space<vmem>>, vector<1x128xf32>
    %c0_7 = arith.constant 0 : index
    %c0_8 = arith.constant 0 : index
    %4 = vector.load %arg1[%c0_7, %c0_8] : memref<8x8xf32, #tpu.memory_space<vmem>>, vector<8x8xf32>
    %5 = arith.truncf %4 : vector<8x8xf32> to vector<8x8xbf16>
    %cst = arith.constant dense<0.000000e+00> : vector<8x256xf32>
    %6 = tpu.matmul %5, %0, %cst {dimension_numbers = #tpu.dot_dimension_numbers<[1], [0], [0], [1], [0, 0, 1, 1], [], []>} : vector<8x8xbf16>, vector<8x256xbf16>, vector<8x256xf32> -> vector<8x256xf32>
    %7 = vector.broadcast %1 : vector<1x256xf32> to vector<8x256xf32>
    %8 = arith.addf %6, %7 : vector<8x256xf32>
    %cst_9 = arith.constant 0.000000e+00 : f32
    %9 = vector.broadcast %cst_9 : f32 to vector<8x256xf32>
    %10 = arith.maximumf %8, %9 : vector<8x256xf32>
    %11 = arith.truncf %10 : vector<8x256xf32> to vector<8x256xbf16>
    %c0_10 = arith.constant 0 : index
    %c0_11 = arith.constant 0 : index
    %c0_12 = arith.constant 0 : index
    %12 = vector.load %arg4[%c0_10, %c0_11, %c0_12] : memref<5x256x256xbf16, #tpu.memory_space<vmem>>, vector<1x256x256xbf16>
    %13 = vector.shape_cast %12 : vector<1x256x256xbf16> to vector<256x256xbf16>
    %c0_13 = arith.constant 0 : index
    %c0_14 = arith.constant 0 : index
    %c0_15 = arith.constant 0 : index
    %14 = vector.load %arg5[%c0_13, %c0_14, %c0_15] : memref<5x1x256xf32, #tpu.memory_space<vmem>>, vector<1x1x256xf32>
    %15 = vector.shape_cast %14 : vector<1x1x256xf32> to vector<1x256xf32>
    %cst_16 = arith.constant dense<0.000000e+00> : vector<8x256xf32>
    %16 = tpu.matmul %11, %13, %cst_16 {dimension_numbers = #tpu.dot_dimension_numbers<[1], [0], [0], [1], [0, 0, 1, 1], [], []>} : vector<8x256xbf16>, vector<256x256xbf16>, vector<8x256xf32> -> vector<8x256xf32>
    %17 = vector.broadcast %15 : vector<1x256xf32> to vector<8x256xf32>
    %18 = arith.addf %16, %17 : vector<8x256xf32>
    %cst_17 = arith.constant 0.000000e+00 : f32
    %19 = vector.broadcast %cst_17 : f32 to vector<8x256xf32>
    %20 = arith.maximumf %18, %19 : vector<8x256xf32>
    %21 = arith.truncf %20 : vector<8x256xf32> to vector<8x256xbf16>
    %c1 = arith.constant 1 : index
    %c0_18 = arith.constant 0 : index
    %c0_19 = arith.constant 0 : index
    %22 = vector.load %arg4[%c1, %c0_18, %c0_19] : memref<5x256x256xbf16, #tpu.memory_space<vmem>>, vector<1x256x256xbf16>
    %23 = vector.shape_cast %22 : vector<1x256x256xbf16> to vector<256x256xbf16>
    %c1_20 = arith.constant 1 : index
    %c0_21 = arith.constant 0 : index
    %c0_22 = arith.constant 0 : index
    %24 = vector.load %arg5[%c1_20, %c0_21, %c0_22] : memref<5x1x256xf32, #tpu.memory_space<vmem>>, vector<1x1x256xf32>
    %25 = vector.shape_cast %24 : vector<1x1x256xf32> to vector<1x256xf32>
    %cst_23 = arith.constant dense<0.000000e+00> : vector<8x256xf32>
    %26 = tpu.matmul %21, %23, %cst_23 {dimension_numbers = #tpu.dot_dimension_numbers<[1], [0], [0], [1], [0, 0, 1, 1], [], []>} : vector<8x256xbf16>, vector<256x256xbf16>, vector<8x256xf32> -> vector<8x256xf32>
    %27 = vector.broadcast %25 : vector<1x256xf32> to vector<8x256xf32>
    %28 = arith.addf %26, %27 : vector<8x256xf32>
    %cst_24 = arith.constant 0.000000e+00 : f32
    %29 = vector.broadcast %cst_24 : f32 to vector<8x256xf32>
    %30 = arith.maximumf %28, %29 : vector<8x256xf32>
    %31 = arith.truncf %30 : vector<8x256xf32> to vector<8x256xbf16>
    %c2 = arith.constant 2 : index
    %c0_25 = arith.constant 0 : index
    %c0_26 = arith.constant 0 : index
    %32 = vector.load %arg4[%c2, %c0_25, %c0_26] : memref<5x256x256xbf16, #tpu.memory_space<vmem>>, vector<1x256x256xbf16>
    %33 = vector.shape_cast %32 : vector<1x256x256xbf16> to vector<256x256xbf16>
    %c2_27 = arith.constant 2 : index
    %c0_28 = arith.constant 0 : index
    %c0_29 = arith.constant 0 : index
    %34 = vector.load %arg5[%c2_27, %c0_28, %c0_29] : memref<5x1x256xf32, #tpu.memory_space<vmem>>, vector<1x1x256xf32>
    %35 = vector.shape_cast %34 : vector<1x1x256xf32> to vector<1x256xf32>
    %cst_30 = arith.constant dense<0.000000e+00> : vector<8x256xf32>
    %36 = tpu.matmul %31, %33, %cst_30 {dimension_numbers = #tpu.dot_dimension_numbers<[1], [0], [0], [1], [0, 0, 1, 1], [], []>} : vector<8x256xbf16>, vector<256x256xbf16>, vector<8x256xf32> -> vector<8x256xf32>
    %37 = vector.broadcast %35 : vector<1x256xf32> to vector<8x256xf32>
    %38 = arith.addf %36, %37 : vector<8x256xf32>
    %cst_31 = arith.constant 0.000000e+00 : f32
    %39 = vector.broadcast %cst_31 : f32 to vector<8x256xf32>
    %40 = arith.maximumf %38, %39 : vector<8x256xf32>
    %41 = arith.truncf %40 : vector<8x256xf32> to vector<8x256xbf16>
    %c3 = arith.constant 3 : index
    %c0_32 = arith.constant 0 : index
    %c0_33 = arith.constant 0 : index
    %42 = vector.load %arg4[%c3, %c0_32, %c0_33] : memref<5x256x256xbf16, #tpu.memory_space<vmem>>, vector<1x256x256xbf16>
    %43 = vector.shape_cast %42 : vector<1x256x256xbf16> to vector<256x256xbf16>
    %c3_34 = arith.constant 3 : index
    %c0_35 = arith.constant 0 : index
    %c0_36 = arith.constant 0 : index
    %44 = vector.load %arg5[%c3_34, %c0_35, %c0_36] : memref<5x1x256xf32, #tpu.memory_space<vmem>>, vector<1x1x256xf32>
    %45 = vector.shape_cast %44 : vector<1x1x256xf32> to vector<1x256xf32>
    %cst_37 = arith.constant dense<0.000000e+00> : vector<8x256xf32>
    %46 = tpu.matmul %41, %43, %cst_37 {dimension_numbers = #tpu.dot_dimension_numbers<[1], [0], [0], [1], [0, 0, 1, 1], [], []>} : vector<8x256xbf16>, vector<256x256xbf16>, vector<8x256xf32> -> vector<8x256xf32>
    %47 = vector.broadcast %45 : vector<1x256xf32> to vector<8x256xf32>
    %48 = arith.addf %46, %47 : vector<8x256xf32>
    %cst_38 = arith.constant 0.000000e+00 : f32
    %49 = vector.broadcast %cst_38 : f32 to vector<8x256xf32>
    %50 = arith.maximumf %48, %49 : vector<8x256xf32>
    %51 = arith.truncf %50 : vector<8x256xf32> to vector<8x256xbf16>
    %c4 = arith.constant 4 : index
    %c0_39 = arith.constant 0 : index
    %c0_40 = arith.constant 0 : index
    %52 = vector.load %arg4[%c4, %c0_39, %c0_40] : memref<5x256x256xbf16, #tpu.memory_space<vmem>>, vector<1x256x256xbf16>
    %53 = vector.shape_cast %52 : vector<1x256x256xbf16> to vector<256x256xbf16>
    %c4_41 = arith.constant 4 : index
    %c0_42 = arith.constant 0 : index
    %c0_43 = arith.constant 0 : index
    %54 = vector.load %arg5[%c4_41, %c0_42, %c0_43] : memref<5x1x256xf32, #tpu.memory_space<vmem>>, vector<1x1x256xf32>
    %55 = vector.shape_cast %54 : vector<1x1x256xf32> to vector<1x256xf32>
    %cst_44 = arith.constant dense<0.000000e+00> : vector<8x256xf32>
    %56 = tpu.matmul %51, %53, %cst_44 {dimension_numbers = #tpu.dot_dimension_numbers<[1], [0], [0], [1], [0, 0, 1, 1], [], []>} : vector<8x256xbf16>, vector<256x256xbf16>, vector<8x256xf32> -> vector<8x256xf32>
    %57 = vector.broadcast %55 : vector<1x256xf32> to vector<8x256xf32>
    %58 = arith.addf %56, %57 : vector<8x256xf32>
    %cst_45 = arith.constant 0.000000e+00 : f32
    %59 = vector.broadcast %cst_45 : f32 to vector<8x256xf32>
    %60 = arith.maximumf %58, %59 : vector<8x256xf32>
    %61 = arith.truncf %60 : vector<8x256xf32> to vector<8x256xbf16>
    %cst_46 = arith.constant dense<0.000000e+00> : vector<8x128xf32>
    %62 = tpu.matmul %61, %2, %cst_46 {dimension_numbers = #tpu.dot_dimension_numbers<[1], [0], [0], [1], [0, 0, 1, 1], [], []>} : vector<8x256xbf16>, vector<256x128xbf16>, vector<8x128xf32> -> vector<8x128xf32>
    %63 = vector.broadcast %3 : vector<1x128xf32> to vector<8x128xf32>
    %64 = arith.addf %62, %63 : vector<8x128xf32>
    %65 = vector.extract_strided_slice %64 {offsets = [0, 0], sizes = [8, 4], strides = [1, 1]} : vector<8x128xf32> to vector<8x4xf32>
    %c0_47 = arith.constant 0 : index
    %c0_48 = arith.constant 0 : index
    %66 = vector.load %arg8[%c0_47, %c0_48] : memref<8x4xf32, #tpu.memory_space<vmem>>, vector<8x4xf32>
    tpu.vector_store %arg8[%c0_47, %c0_48], %65 {strides = array<i32>} : memref<8x4xf32, #tpu.memory_space<vmem>>, vector<8x4xf32>,
    return
  }
  func.func @transform_0(%arg0: i32) -> (i32, i32) {
    %c0_i32 = arith.constant 0 : i32
    %c0_i32_0 = arith.constant 0 : i32
    return %arg0, %c0_i32 : i32, i32
  }
  func.func @transform_1(%arg0: i32) -> (i32, i32) {
    %c0_i32 = arith.constant 0 : i32
    %c0_i32_0 = arith.constant 0 : i32
    %c0_i32_1 = arith.constant 0 : i32
    return %c0_i32, %c0_i32_0 : i32, i32
  }
  func.func @transform_2(%arg0: i32) -> (i32, i32) {
    %c0_i32 = arith.constant 0 : i32
    %c0_i32_0 = arith.constant 0 : i32
    %c0_i32_1 = arith.constant 0 : i32
    return %c0_i32, %c0_i32_0 : i32, i32
  }
  func.func @transform_3(%arg0: i32) -> (i32, i32, i32) {
    %c0_i32 = arith.constant 0 : i32
    %c0_i32_0 = arith.constant 0 : i32
    %c0_i32_1 = arith.constant 0 : i32
    %c0_i32_2 = arith.constant 0 : i32
    return %c0_i32, %c0_i32_0, %c0_i32_1 : i32, i32, i32
  }
  func.func @transform_4(%arg0: i32) -> (i32, i32, i32) {
    %c0_i32 = arith.constant 0 : i32
    %c0_i32_0 = arith.constant 0 : i32
    %c0_i32_1 = arith.constant 0 : i32
    %c0_i32_2 = arith.constant 0 : i32
    return %c0_i32, %c0_i32_0, %c0_i32_1 : i32, i32, i32
  }
  func.func @transform_5(%arg0: i32) -> (i32, i32) {
    %c0_i32 = arith.constant 0 : i32
    %c0_i32_0 = arith.constant 0 : i32
    %c0_i32_1 = arith.constant 0 : i32
    return %c0_i32, %c0_i32_0 : i32, i32
  }
  func.func @transform_6(%arg0: i32) -> (i32, i32) {
    %c0_i32 = arith.constant 0 : i32
    %c0_i32_0 = arith.constant 0 : i32
    %c0_i32_1 = arith.constant 0 : i32
    return %c0_i32, %c0_i32_0 : i32, i32
  }
  func.func @transform_7(%arg0: i32) -> (i32, i32) {
    %c0_i32 = arith.constant 0 : i32
    %c0_i32_0 = arith.constant 0 : i32
    return %arg0, %c0_i32 : i32, i32
  }
}

</mosaic_0001>

<bundles_post_ra>
// kernel: tpu_custom_call.1
= control target key start
LH: loop header
LB: loop body
LE: loop exit
PB: predicated region body
PF: predicated region fallthrough
CT: control target
= control target key end

     0   :  { %12 = vsyncpa [#allocation3], 0  ;;  %s2296_s0 = inlined_call_operand.hbm [shape: f32[8,8], index: 0, kind: input, shape index: {}]   ;;  %s2297_s1 = inlined_call_operand.hbm [shape: bf16[8,256], index: 1, kind: input, shape index: {}]   ;;  %s2298_s2 = inlined_call_operand.vmem [shape: f32[1,256], index: 2, kind: input, shape index: {}]   ;;  %s2299_s3 = inlined_call_operand.hbm [shape: bf16[5,256,256], index: 3, kind: input, shape index: {}]   ;;  %s2300_s4 = inlined_call_operand.vmem [shape: f32[5,1,256], index: 4, kind: input, shape index: {}]   ;;  %s2301_s5 = inlined_call_operand.hbm [shape: bf16[256,128], index: 5, kind: input, shape index: {}]   ;;  %s2302_s6 = inlined_call_operand.vmem [shape: f32[1,128], index: 6, kind: input, shape index: {}]   ;;  %s2303_s7 = inlined_call_operand.vmem [shape: f32[8,4], index: 7, kind: output, shape index: {}]  }
   0x1   :  { %13 = vsyncpa [#allocation5], 0 }
   0x2   :  { %14 = vsyncpa [#allocation8], 0  ;;  %s2159_s24 = smov [#allocation4]   ;;  %s2160_s26 = smov [#allocation2]  }
   0x3   :  { %s31_s25 = sshll.u32 %s2159_s24, 4  ;;  %s21_s27 = sshll.u32 %s2160_s26, 4  ;;  %s32_s25 = int_to_ptr.vmem [resolvable:$true] %s31_s25  ;;  %s22_s27 = int_to_ptr.vmem [resolvable:$true] %s21_s27 }
   0x4   :  { %s2065_s30 = scalar_lea.hbm %s2297_s1, 128 }
   0x5   :  { %p2066_p0 = scmp.ne.s32.totalorder %s2297_s1, %s2065_s30  ;;  %p2069_p1 = scmp.lt.u32.totalorder %s2065_s30, %s2297_s1 }
   0x7   :  { %p2071_p2 = pnand %p2069_p1, %p2066_p0 }
   0x9   :  { %2074 = shalt.err (!%p2071_p2)
}
   0xa   :  { %s2075_s12 = scalar_lea.vmem %s32_s25, 128  ;;  %p2080_p4 = scmp.lt.s32.totalorder %s32_s25, %s32_s25 }
   0xb   :  { %p2076_p3 = scmp.ne.s32.totalorder %s32_s25, %s2075_s12  ;;  %p2081_p5 = scmp.lt.s32.totalorder %s2075_s12, %s2075_s12 }
   0xd   :  { %p2082_p6 = por %p2081_p5, %p2080_p4 }
   0xf   :  { %p2083_p7 = pnand %p2082_p6, %p2076_p3 }
  0x11   :  { %2086 = shalt.err (!%p2083_p7)
}
  0x12   :  { %34 = dma.hbm_to_vmem [thread:$0]  %s2297_s1, 128, %s32_s25, [#allocation5]  }
  0x13   :  { %s2087_s17 = scalar_lea.hbm %s2296_s0, 128 }
  0x14   :  { %p2088_p8 = scmp.ne.s32.totalorder %s2296_s0, %s2087_s17  ;;  %p2091_p9 = scmp.lt.u32.totalorder %s2087_s17, %s2296_s0 }
  0x16   :  { %p2093_p10 = pnand %p2091_p9, %p2088_p8 }
  0x18   :  { %2096 = shalt.err (!%p2093_p10)
}
  0x19   :  { %s2097_s22 = scalar_lea.vmem %s22_s27, 128  ;;  %p2102_p12 = scmp.lt.s32.totalorder %s22_s27, %s22_s27 }
  0x1a   :  { %p2098_p11 = scmp.ne.s32.totalorder %s22_s27, %s2097_s22  ;;  %p2103_p13 = scmp.lt.s32.totalorder %s2097_s22, %s2097_s22 }
  0x1c   :  { %p2104_p0 = por %p2103_p13, %p2102_p12 }
  0x1e   :  { %p2105_p1 = pnand %p2104_p0, %p2098_p11 }
  0x20   :  { %2108 = shalt.err (!%p2105_p1)
}
  0x21   :  { %24 = dma.hbm_to_vmem [thread:$0]  %s2296_s0, 128, %s22_s27, [#allocation3]  }
  0x22   :  { %s2161_s24 = smov [#allocation6]   ;;  %s2109_s29 = scalar_lea.hbm %s2299_s3, 20480 }
  0x23   :  { %s42_s25 = sshll.u32 %s2161_s24, 4  ;;  %p2110_p2 = scmp.ne.s32.totalorder %s2299_s3, %s2109_s29  ;;  %s43_s25 = int_to_ptr.vmem [resolvable:$true] %s42_s25 }
  0x24   :  { %p2113_p3 = scmp.lt.u32.totalorder %s2109_s29, %s2299_s3 }
  0x26   :  { %p2115_p4 = pnand %p2113_p3, %p2110_p2 }
  0x28   :  { %2118 = shalt.err (!%p2115_p4)
}
  0x29   :  { %s2119_s11 = scalar_lea.vmem %s43_s25, 20480  ;;  %p2124_p6 = scmp.lt.s32.totalorder %s43_s25, %s43_s25 }
  0x2a   :  { %p2120_p5 = scmp.ne.s32.totalorder %s43_s25, %s2119_s11  ;;  %p2125_p7 = scmp.lt.s32.totalorder %s2119_s11, %s2119_s11 }
  0x2c   :  { %p2126_p8 = por %p2125_p7, %p2124_p6 }
  0x2e   :  { %p2127_p9 = pnand %p2126_p8, %p2120_p5 }
  0x30   :  { %2130 = shalt.err (!%p2127_p9)
}
  0x31   :  { %s2162_s0 = smov 128   ;;  %s2163_s27 = smov 8  }
  0x32   :  { %48 = dma.hbm_to_vmem [thread:$0]  %s2299_s3, 20480, %s43_s25, [#allocation5], %s2162_s0, %s2162_s0, %s2163_s27  }
  0x33   :  { %s2164_s14 = smov [#allocation7]   ;;  %s2131_s18 = scalar_lea.hbm %s2301_s5, 2048 }
  0x34   :  { %s56_s15 = sshll.u32 %s2164_s14, 4  ;;  %p2132_p10 = scmp.ne.s32.totalorder %s2301_s5, %s2131_s18  ;;  %s57_s15 = int_to_ptr.vmem [resolvable:$true] %s56_s15 }
  0x35   :  { %p2135_p11 = scmp.lt.u32.totalorder %s2131_s18, %s2301_s5 }
  0x37   :  { %p2137_p12 = pnand %p2135_p11, %p2132_p10 }
  0x39   :  { %2140 = shalt.err (!%p2137_p12)
}
  0x3a   :  { %s2141_s1 = scalar_lea.vmem %s57_s15, 2048  ;;  %p2146_p0 = scmp.lt.s32.totalorder %s57_s15, %s57_s15 }
  0x3b   :  { %p2142_p13 = scmp.ne.s32.totalorder %s57_s15, %s2141_s1  ;;  %p2147_p1 = scmp.lt.s32.totalorder %s2141_s1, %s2141_s1 }
  0x3d   :  { %p2148_p2 = por %p2147_p1, %p2146_p0 }
  0x3f   :  { %p2149_p3 = pnand %p2148_p2, %p2142_p13 }
  0x41   :  { %2152 = shalt.err (!%p2149_p3)
}
  0x42   :  { %s2165_s3 = smov 64   ;;  %s2166_s23 = smov 4  }
  0x43   :  { %62 = dma.hbm_to_vmem [thread:$0]  %s2301_s5, 2048, %s57_s15, [#allocation8], %s2165_s3, %s2165_s3, %s2166_s23  }
  0x44   :  { %2153 = dma.done.wait [#allocation3], 128  }
  0x45   :  { %2154 = vsyncadd [#allocation3], 4294967168 }
  0x46   :  { %2155 = dma.done.wait [#allocation5], 20608  }
  0x47   :  { %2156 = vsyncadd [#allocation5], 4294946688 }
  0x48   :  { %2157 = dma.done.wait [#allocation8], 2048  }
  0x49   :  { %2158 = vsyncadd [#allocation8], 4294965248  ;;  %v2167_v0 = vmov 0   ;;  %v78_v1 = vld [vmem:[#allocation4] sm:$0xff]  ;;  %vm135_vm0 = vcmask 1043456   ;;  %v113_v2 = vld [vmem:[#allocation2] sm:$0xff] }
  0x4a   :  { %174 = vmatprep.mubr.bf16.mxu0 %v2167_v0  ;;  %v1592_v3 = vcombine.high %v78_v1, %v78_v1  ;;  %v1591_v4 = vcombine.low %v78_v1, %v78_v1  ;;  %v1809_v5 = vld [vmem:[#allocation6 + $0x4] ss:$8 sps:$4 sm:$0xff]   ;;  %v1811_v6 = vld [vmem:[#allocation6] ss:$8 sps:$4 sm:$0xff]   ;;  %v1812_v7 = vld [vmem:[#allocation6 + $0x14] ss:$8 sps:$4 sm:$0xff]   ;;  %v114_v9 = vpack.c.bf16 %v113_v2, %v113_v2 }
  0x4b   :  { %391 = vmatprep.subr.bf16.mxu1 %v1809_v5  ;;  %vm131_vm1 = vcmask 64512   ;;  %v1814_v10 = vld [vmem:[#allocation6 + $0x10] ss:$8 sps:$4 sm:$0xff]   ;;  %v1815_v11 = vld [vmem:[#allocation6 + $0x24] ss:$8 sps:$4 sm:$0xff]   ;;  %vm1582_vm2 = vcmask 31744  }
  0x4c   :  { %1593 = vmatprep.subr.msk.bf16.mxu0 %vm135_vm0, %v1592_v3  ;;  %v137_v8 = vsel %vm135_vm0, %v1591_v4, 0  ;;  %392 = vmatpush1.bf16.msra.mxu1 %v1811_v6  ;;  %v1817_v12 = vld [vmem:[#allocation6 + $0x20] ss:$8 sps:$4 sm:$0xff]   ;;  %v1818_v13 = vld [vmem:[#allocation6 + $0x34] ss:$8 sps:$4 sm:$0xff]   ;;  %v116_v3 = vlaneseq }
  0x4d   :  { %143 = vmatpush1.bf16.msra.mxu0 %v137_v8  ;;  %393 = vmatprep.subr.bf16.mxu1 %v1812_v7  ;;  %v1820_v14 = vld [vmem:[#allocation6 + $0x30] ss:$8 sps:$4 sm:$0xff]   ;;  %v1821_v15 = vld [vmem:[#allocation6 + $0x44] ss:$8 sps:$4 sm:$0xff]   ;;  %v1823_v16 = vld [vmem:[#allocation6 + $0x40] ss:$8 sps:$4 sm:$0xff]  }
  0x4e   :  { %v1824_v17 = vld [vmem:[#allocation6 + $0x54] ss:$8 sps:$4 sm:$0xff]   ;;  %v1826_v18 = vld [vmem:[#allocation6 + $0x50] ss:$8 sps:$4 sm:$0xff]   ;;  %v1827_v19 = vld [vmem:[#allocation6 + $0x64] ss:$8 sps:$4 sm:$0xff]  }
  0x4f   :  { %v1829_v20 = vld [vmem:[#allocation6 + $0x60] ss:$8 sps:$4 sm:$0xff]   ;;  %v1830_v21 = vld [vmem:[#allocation6 + $0x74] ss:$8 sps:$4 sm:$0xff]   ;;  %v1832_v22 = vld [vmem:[#allocation6 + $0x70] ss:$8 sps:$4 sm:$0xff]  }
  0x50   :  { %1594 = vmatmul.mubr.msk.bf16.vlgmr.msra.gmra.mrb[0].mxu0 %vm131_vm1, %v114_v9  ;;  %394 = vmatpush1.bf16.msra.mxu1 %v1814_v10  ;;  %v1833_v23 = vld [vmem:[#allocation6 + $0x84] ss:$8 sps:$4 sm:$0xff]   ;;  %v1835_v24 = vld [vmem:[#allocation6 + $0x80] ss:$8 sps:$4 sm:$0xff]   ;;  %v1836_v25 = vld [vmem:[#allocation6 + $0x94] ss:$8 sps:$4 sm:$0xff]  }
  0x51   :  { %395 = vmatprep.subr.bf16.mxu1 %v1815_v11  ;;  %v1838_v26 = vld [vmem:[#allocation6 + $0x90] ss:$8 sps:$4 sm:$0xff]   ;;  %v1839_v27 = vld [vmem:[#allocation6 + $0xa4] ss:$8 sps:$4 sm:$0xff]   ;;  %v1841_v28 = vld [vmem:[#allocation6 + $0xa0] ss:$8 sps:$4 sm:$0xff]  }
  0x52   :  { %v1842_v29 = vld [vmem:[#allocation6 + $0xb4] ss:$8 sps:$4 sm:$0xff]   ;;  %v1844_v30 = vld [vmem:[#allocation6 + $0xb0] ss:$8 sps:$4 sm:$0xff]   ;;  %v1845_v31 = vld [vmem:[#allocation6 + $0xc4] ss:$8 sps:$4 sm:$0xff]  }
  0x53   :  { %v1847_v32 = vld [vmem:[#allocation6 + $0xc0] ss:$8 sps:$4 sm:$0xff]   ;;  %v1848_v33 = vld [vmem:[#allocation6 + $0xd4] ss:$8 sps:$4 sm:$0xff]   ;;  %v1850_v34 = vld [vmem:[#allocation6 + $0xd0] ss:$8 sps:$4 sm:$0xff]  }
  0x54   :  { %396 = vmatpush1.bf16.msra.mxu1 %v1817_v12  ;;  %v1851_v35 = vld [vmem:[#allocation6 + $0xe4] ss:$8 sps:$4 sm:$0xff]   ;;  %v1853_v36 = vld [vmem:[#allocation6 + $0xe0] ss:$8 sps:$4 sm:$0xff]   ;;  %v1854_v37 = vld [vmem:[#allocation6 + $0xf4] ss:$8 sps:$4 sm:$0xff]  }
  0x55   :  { %397 = vmatprep.subr.bf16.mxu1 %v1818_v13  ;;  %v1856_v38 = vld [vmem:[#allocation6 + $0xf0] ss:$8 sps:$4 sm:$0xff]   ;;  %v1857_v39 = vld [vmem:[#allocation6 + $0x100] ss:$8 sps:$4 sm:$0xff]   ;;  %v1859_v40 = vld [vmem:[#allocation6 + $0x104] ss:$8 sps:$4 sm:$0xff]  }
  0x56   :  { %v1862_v41 = vld [vmem:[#allocation6 + $0x114] ss:$8 sps:$4 sm:$0xff]   ;;  %642 = vmatprep.subr.bf16.mxu0 %v1859_v40  ;;  %v1860_v42 = vld [vmem:[#allocation6 + $0x110] ss:$8 sps:$4 sm:$0xff]   ;;  %v1865_v43 = vld [vmem:[#allocation6 + $0x124] ss:$8 sps:$4 sm:$0xff]  }
  0x57   :  { %643 = vmatpush1.bf16.msra.mxu0 %v1857_v39  ;;  %v1863_v44 = vld [vmem:[#allocation6 + $0x120] ss:$8 sps:$4 sm:$0xff]   ;;  %v1868_v45 = vld [vmem:[#allocation6 + $0x134] ss:$8 sps:$4 sm:$0xff]   ;;  %v1866_v46 = vld [vmem:[#allocation6 + $0x130] ss:$8 sps:$4 sm:$0xff]  }
  0x58   :  { %398 = vmatpush1.bf16.msra.mxu1 %v1820_v14  ;;  %644 = vmatprep.subr.bf16.mxu0 %v1862_v41  ;;  %v1871_v47 = vld [vmem:[#allocation6 + $0x144] ss:$8 sps:$4 sm:$0xff]   ;;  %v1869_v48 = vld [vmem:[#allocation6 + $0x140] ss:$8 sps:$4 sm:$0xff]   ;;  %v1874_v49 = vld [vmem:[#allocation6 + $0x154] ss:$8 sps:$4 sm:$0xff]  }
  0x59   :  { %399 = vmatprep.subr.bf16.mxu1 %v1821_v15  ;;  %v1872_v50 = vld [vmem:[#allocation6 + $0x150] ss:$8 sps:$4 sm:$0xff]   ;;  %v1877_v51 = vld [vmem:[#allocation6 + $0x164] ss:$8 sps:$4 sm:$0xff]   ;;  %v1875_v52 = vld [vmem:[#allocation6 + $0x160] ss:$8 sps:$4 sm:$0xff]  }
  0x5a   :  { %v1880_v53 = vld [vmem:[#allocation6 + $0x174] ss:$8 sps:$4 sm:$0xff]   ;;  %v1878_v54 = vld [vmem:[#allocation6 + $0x170] ss:$8 sps:$4 sm:$0xff]   ;;  %v1883_v55 = vld [vmem:[#allocation6 + $0x184] ss:$8 sps:$4 sm:$0xff]  }
  0x5b   :  { %645 = vmatpush1.bf16.msra.mxu0 %v1860_v42  ;;  %v1881_v56 = vld [vmem:[#allocation6 + $0x180] ss:$8 sps:$4 sm:$0xff]   ;;  %v1886_v57 = vld [vmem:[#allocation6 + $0x194] ss:$8 sps:$4 sm:$0xff]   ;;  %v1884_v58 = vld [vmem:[#allocation6 + $0x190] ss:$8 sps:$4 sm:$0xff]  }
  0x5c   :  { %400 = vmatpush1.bf16.msra.mxu1 %v1823_v16  ;;  %646 = vmatprep.subr.bf16.mxu0 %v1865_v43  ;;  %v1889_v59 = vld [vmem:[#allocation6 + $0x1a4] ss:$8 sps:$4 sm:$0xff]   ;;  %v1887_v60 = vld [vmem:[#allocation6 + $0x1a0] ss:$8 sps:$4 sm:$0xff]   ;;  %v1892_v61 = vld [vmem:[#allocation6 + $0x1b4] ss:$8 sps:$4 sm:$0xff]  }
  0x5d   :  { %401 = vmatprep.subr.bf16.mxu1 %v1824_v17  ;;  %v1890_v62 = vld [vmem:[#allocation6 + $0x1b0] ss:$8 sps:$4 sm:$0xff]   ;;  %v1895_v63 = vld [vmem:[#allocation6 + $0x1c4] ss:$8 sps:$4 sm:$0xff]   ;;  %v1893_v0 = vld [vmem:[#allocation6 + $0x1c0] ss:$8 sps:$4 sm:$0xff]  }
  0x5e   :  { %v1898_v1 = vld [vmem:[#allocation6 + $0x1d4] ss:$8 sps:$4 sm:$0xff]   ;;  %v1896_v2 = vld [vmem:[#allocation6 + $0x1d0] ss:$8 sps:$4 sm:$0xff]   ;;  %v117_v4 = vshrl.u32 %v116_v3, 7 }
  0x5f   :  { %647 = vmatpush1.bf16.msra.mxu0 %v1863_v44  ;;  %v79_v6 = vld [vmem:[%s2298_s2] sm:$0x3]  ;;  %v1926_v39 = vld [vmem:[#allocation6 + $0x270] ss:$8 sps:$4 sm:$0xff]   ;;  %v1931_v40 = vld [vmem:[#allocation6 + $0x284] ss:$8 sps:$4 sm:$0xff]  }
  0x60   :  { %402 = vmatpush1.bf16.msra.mxu1 %v1826_v18  ;;  %648 = vmatprep.subr.bf16.mxu0 %v1868_v45  ;;  %v2256_v5 = vsub.s32 0, %v117_v4  ;;  %v2261_v7 = vsub.s32 1, %v117_v4  ;;  %v1929_v41 = vld [vmem:[#allocation6 + $0x280] ss:$8 sps:$4 sm:$0xff]   ;;  %v1934_v42 = vld [vmem:[#allocation6 + $0x294] ss:$8 sps:$4 sm:$0xff]  }
  0x61   :  { %403 = vmatprep.subr.bf16.mxu1 %v1827_v19  ;;  %v1932_v43 = vld [vmem:[#allocation6 + $0x290] ss:$8 sps:$4 sm:$0xff]   ;;  %v1937_v44 = vld [vmem:[#allocation6 + $0x2a4] ss:$8 sps:$4 sm:$0xff]   ;;  %v1935_v45 = vld [vmem:[#allocation6 + $0x2a0] ss:$8 sps:$4 sm:$0xff]  }
  0x62   :  { %v119_v8 = vrot.slane %v79_v6, %v2256_v5  ;;  %v123_v9 = vrot.slane %v79_v6, %v2261_v7  ;;  %v1952_v3 = vld [vmem:[#allocation6 + $0x2f4] ss:$8 sps:$4 sm:$0xff]   ;;  %v1950_v4 = vld [vmem:[#allocation6 + $0x2f0] ss:$8 sps:$4 sm:$0xff]   ;;  %v1953_v6 = vld [vmem:[#allocation6 + $0x300] ss:$8 sps:$4 sm:$0xff]  }
  0x63   :  { %649 = vmatpush1.bf16.msra.mxu0 %v1866_v46  ;;  %v1940_v46 = vld [vmem:[#allocation6 + $0x2b4] ss:$8 sps:$4 sm:$0xff]  }
  0x64   :  { %404 = vmatpush1.bf16.msra.mxu1 %v1829_v20  ;;  %650 = vmatprep.subr.bf16.mxu0 %v1871_v47  ;;  %v1901_v20 = vld [vmem:[#allocation6 + $0x1e4] ss:$8 sps:$4 sm:$0xff]   ;;  %v1938_v47 = vld [vmem:[#allocation6 + $0x2b0] ss:$8 sps:$4 sm:$0xff]  }
  0x65   :  { %405 = vmatprep.subr.bf16.mxu1 %v1830_v21  ;;  %v1899_v21 = vld [vmem:[#allocation6 + $0x1e0] ss:$8 sps:$4 sm:$0xff]  }
  0x67   :  { %651 = vmatpush1.bf16.msra.mxu0 %v1869_v48  ;;  %v1943_v48 = vld [vmem:[#allocation6 + $0x2c4] ss:$8 sps:$4 sm:$0xff]  }
  0x68   :  { %406 = vmatpush1.bf16.msra.mxu1 %v1832_v22  ;;  %652 = vmatprep.subr.bf16.mxu0 %v1874_v49  ;;  %v1904_v22 = vld [vmem:[#allocation6 + $0x1f4] ss:$8 sps:$4 sm:$0xff]   ;;  %v1941_v49 = vld [vmem:[#allocation6 + $0x2c0] ss:$8 sps:$4 sm:$0xff]  }
  0x69   :  { %407 = vmatprep.subr.bf16.mxu1 %v1833_v23  ;;  %v1902_v23 = vld [vmem:[#allocation6 + $0x1f0] ss:$8 sps:$4 sm:$0xff]  }
  0x6b   :  { %653 = vmatpush1.bf16.msra.mxu0 %v1872_v50  ;;  %v1946_v50 = vld [vmem:[#allocation6 + $0x2d4] ss:$8 sps:$4 sm:$0xff]  }
  0x6c   :  { %408 = vmatpush1.bf16.msra.mxu1 %v1835_v24  ;;  %654 = vmatprep.subr.bf16.mxu0 %v1877_v51  ;;  %v1905_v24 = vld [vmem:[#allocation6 + $0x200] ss:$8 sps:$4 sm:$0xff]   ;;  %v1944_v51 = vld [vmem:[#allocation6 + $0x2d0] ss:$8 sps:$4 sm:$0xff]  }
  0x6d   :  { %409 = vmatprep.subr.bf16.mxu1 %v1836_v25  ;;  %v1907_v25 = vld [vmem:[#allocation6 + $0x204] ss:$8 sps:$4 sm:$0xff]  }
  0x6f   :  { %655 = vmatpush1.bf16.msra.mxu0 %v1875_v52  ;;  %v219_v52 = vld [vmem:[%s2300_s4] sm:$0x3] }
  0x70   :  { %410 = vmatpush1.bf16.msra.mxu1 %v1838_v26  ;;  %656 = vmatprep.subr.bf16.mxu0 %v1880_v53  ;;  %v1910_v26 = vld [vmem:[#allocation6 + $0x214] ss:$8 sps:$4 sm:$0xff]   ;;  %v224_v53 = vrot.slane %v219_v52, %v2256_v5 }
  0x71   :  { %411 = vmatprep.subr.bf16.mxu1 %v1839_v27  ;;  %v1908_v27 = vld [vmem:[#allocation6 + $0x210] ss:$8 sps:$4 sm:$0xff]  }
  0x73   :  { %657 = vmatpush1.bf16.msra.mxu0 %v1878_v54  ;;  %v228_v54 = vrot.slane %v219_v52, %v2261_v7  ;;  %v2001_v52 = vld [vmem:[#allocation6 + $0x400] ss:$8 sps:$4 sm:$0xff]  }
  0x74   :  { %412 = vmatpush1.bf16.msra.mxu1 %v1841_v28  ;;  %658 = vmatprep.subr.bf16.mxu0 %v1883_v55  ;;  %v1913_v28 = vld [vmem:[#allocation6 + $0x224] ss:$8 sps:$4 sm:$0xff]  }
  0x75   :  { %413 = vmatprep.subr.bf16.mxu1 %v1842_v29  ;;  %v1911_v29 = vld [vmem:[#allocation6 + $0x220] ss:$8 sps:$4 sm:$0xff]  }
  0x77   :  { %659 = vmatpush1.bf16.msra.mxu0 %v1881_v56 }
  0x78   :  { %414 = vmatpush1.bf16.msra.mxu1 %v1844_v30  ;;  %660 = vmatprep.subr.bf16.mxu0 %v1886_v57  ;;  %v1916_v30 = vld [vmem:[#allocation6 + $0x234] ss:$8 sps:$4 sm:$0xff]  }
  0x79   :  { %415 = vmatprep.subr.bf16.mxu1 %v1845_v31  ;;  %v1914_v31 = vld [vmem:[#allocation6 + $0x230] ss:$8 sps:$4 sm:$0xff]  }
  0x7b   :  { %661 = vmatpush1.bf16.msra.mxu0 %v1884_v58 }
  0x7c   :  { %416 = vmatpush1.bf16.msra.mxu1 %v1847_v32  ;;  %662 = vmatprep.subr.bf16.mxu0 %v1889_v59  ;;  %v1919_v32 = vld [vmem:[#allocation6 + $0x244] ss:$8 sps:$4 sm:$0xff]  }
  0x7d   :  { %417 = vmatprep.subr.bf16.mxu1 %v1848_v33  ;;  %v1917_v33 = vld [vmem:[#allocation6 + $0x240] ss:$8 sps:$4 sm:$0xff]  }
  0x7f   :  { %663 = vmatpush1.bf16.msra.mxu0 %v1887_v60 }
  0x80   :  { %418 = vmatpush1.bf16.msra.mxu1 %v1850_v34  ;;  %664 = vmatprep.subr.bf16.mxu0 %v1892_v61  ;;  %v1922_v34 = vld [vmem:[#allocation6 + $0x254] ss:$8 sps:$4 sm:$0xff]  }
  0x81   :  { %419 = vmatprep.subr.bf16.mxu1 %v1851_v35  ;;  %v1920_v35 = vld [vmem:[#allocation6 + $0x250] ss:$8 sps:$4 sm:$0xff]  }
  0x83   :  { %665 = vmatpush1.bf16.msra.mxu0 %v1890_v62 }
  0x84   :  { %420 = vmatpush1.bf16.msra.mxu1 %v1853_v36  ;;  %666 = vmatprep.subr.bf16.mxu0 %v1895_v63  ;;  %v1925_v36 = vld [vmem:[#allocation6 + $0x264] ss:$8 sps:$4 sm:$0xff]  }
  0x85   :  { %421 = vmatprep.subr.bf16.mxu1 %v1854_v37  ;;  %v1923_v37 = vld [vmem:[#allocation6 + $0x260] ss:$8 sps:$4 sm:$0xff]  }
  0x87   :  { %667 = vmatpush1.bf16.msra.mxu0 %v1893_v0 }
  0x88   :  { %422 = vmatpush1.bf16.msra.mxu1 %v1856_v38  ;;  %668 = vmatprep.subr.bf16.mxu0 %v1898_v1  ;;  %v1928_v38 = vld [vmem:[#allocation6 + $0x274] ss:$8 sps:$4 sm:$0xff]   ;;  %v1949_v1 = vld [vmem:[#allocation6 + $0x2e4] ss:$8 sps:$4 sm:$0xff]  }
  0x89   :  { %893 = vmatprep.subr.bf16.mxu1 %v1907_v25  ;;  %v1982_v25 = vld [vmem:[#allocation6 + $0x394] ss:$8 sps:$4 sm:$0xff]  }
  0x8b   :  { %669 = vmatpush1.bf16.msra.mxu0 %v1896_v2  ;;  %v1947_v2 = vld [vmem:[#allocation6 + $0x2e0] ss:$8 sps:$4 sm:$0xff]  }
  0x8c   :  { %670 = vmatprep.subr.bf16.mxu0 %v1901_v20  ;;  %v1971_v20 = vld [vmem:[#allocation6 + $0x360] ss:$8 sps:$4 sm:$0xff]  }
  0x8f   :  { %671 = vmatpush1.bf16.msra.mxu0 %v1899_v21  ;;  %v1976_v21 = vld [vmem:[#allocation6 + $0x374] ss:$8 sps:$4 sm:$0xff]  }
  0x90   :  { %672 = vmatprep.subr.bf16.mxu0 %v1904_v22  ;;  %v1974_v22 = vld [vmem:[#allocation6 + $0x370] ss:$8 sps:$4 sm:$0xff]  }
  0x93   :  { %673 = vmatpush1.bf16.msra.mxu0 %v1902_v23  ;;  %v1979_v23 = vld [vmem:[#allocation6 + $0x384] ss:$8 sps:$4 sm:$0xff]  }
 0x123   :  { %v176_v10 = vpop.f32.mrb[0].mxu0 }
 0x124   :  { %v177_v11 = vadd.f32 %v176_v10, %v119_v8  ;;  %v178_v12 = vpop.f32.mrb[1].mxu0  ;;  %v1955_v8 = vld [vmem:[#allocation6 + $0x304] ss:$8 sps:$4 sm:$0xff]   ;;  %v1956_v10 = vld [vmem:[#allocation6 + $0x310] ss:$8 sps:$4 sm:$0xff]  }
 0x125   :  { %v179_v13 = vadd.f32 %v178_v12, %v123_v9  ;;  %v180_v14 = vpop.f32.mrb[2].mxu0  ;;  %v1958_v9 = vld [vmem:[#allocation6 + $0x314] ss:$8 sps:$4 sm:$0xff]   ;;  %1144 = vmatprep.subr.bf16.mxu0 %v1955_v8  ;;  %v1959_v12 = vld [vmem:[#allocation6 + $0x320] ss:$8 sps:$4 sm:$0xff]  }
 0x126   :  { %v183_v15 = vmax.f32 %v177_v11, 0.0  ;;  %v181_v16 = vpop.f32.mrb[3].mxu0  ;;  %v1961_v11 = vld [vmem:[#allocation6 + $0x324] ss:$8 sps:$4 sm:$0xff]   ;;  %v1962_v14 = vld [vmem:[#allocation6 + $0x330] ss:$8 sps:$4 sm:$0xff]  }
 0x127   :  { %v184_v17 = vmax.f32 %v179_v13, 0.0  ;;  %v1964_v13 = vld [vmem:[#allocation6 + $0x334] ss:$8 sps:$4 sm:$0xff]   ;;  %v1965_v16 = vld [vmem:[#allocation6 + $0x340] ss:$8 sps:$4 sm:$0xff]  }
 0x128   :  { %v185_v19 = vpack.c.bf16 %v183_v15, %v183_v15  ;;  %v1967_v15 = vld [vmem:[#allocation6 + $0x344] ss:$8 sps:$4 sm:$0xff]   ;;  %v2030_v8 = vld [vmem:[#allocation6 + $0x494] ss:$8 sps:$4 sm:$0xff]  }
 0x129   :  { %v186_v18 = vpack.c.bf16 %v184_v17, %v184_v17  ;;  %v1970_v17 = vld [vmem:[#allocation6 + $0x354] ss:$8 sps:$4 sm:$0xff]  }
 0x12b   :  { %423 = vmatprep.mubr.bf16.mxu1 %v186_v18  ;;  %v1968_v18 = vld [vmem:[#allocation6 + $0x350] ss:$8 sps:$4 sm:$0xff]  }
 0x12c   :  { %424 = vmatmul.mubr.bf16.vlgmr.msra.gmra.mrb[0].mxu1 %v185_v19  ;;  %v1973_v19 = vld [vmem:[#allocation6 + $0x364] ss:$8 sps:$4 sm:$0xff]  }
 0x12d   :  { %894 = vmatpush1.bf16.msra.mxu1 %v1905_v24  ;;  %v1977_v24 = vld [vmem:[#allocation6 + $0x380] ss:$8 sps:$4 sm:$0xff]  }
 0x12e   :  { %895 = vmatprep.subr.bf16.mxu1 %v1910_v26  ;;  %v1980_v26 = vld [vmem:[#allocation6 + $0x390] ss:$8 sps:$4 sm:$0xff]  }
 0x131   :  { %896 = vmatpush1.bf16.msra.mxu1 %v1908_v27  ;;  %v1985_v27 = vld [vmem:[#allocation6 + $0x3a4] ss:$8 sps:$4 sm:$0xff]  }
 0x132   :  { %897 = vmatprep.subr.bf16.mxu1 %v1913_v28  ;;  %v1983_v28 = vld [vmem:[#allocation6 + $0x3a0] ss:$8 sps:$4 sm:$0xff]  }
 0x135   :  { %898 = vmatpush1.bf16.msra.mxu1 %v1911_v29  ;;  %v1988_v29 = vld [vmem:[#allocation6 + $0x3b4] ss:$8 sps:$4 sm:$0xff]  }
 0x136   :  { %899 = vmatprep.subr.bf16.mxu1 %v1916_v30  ;;  %v1986_v30 = vld [vmem:[#allocation6 + $0x3b0] ss:$8 sps:$4 sm:$0xff]  }
 0x139   :  { %900 = vmatpush1.bf16.msra.mxu1 %v1914_v31  ;;  %v1991_v31 = vld [vmem:[#allocation6 + $0x3c4] ss:$8 sps:$4 sm:$0xff]  }
 0x13a   :  { %901 = vmatprep.subr.bf16.mxu1 %v1919_v32  ;;  %v1989_v32 = vld [vmem:[#allocation6 + $0x3c0] ss:$8 sps:$4 sm:$0xff]  }
 0x13d   :  { %902 = vmatpush1.bf16.msra.mxu1 %v1917_v33  ;;  %v1994_v33 = vld [vmem:[#allocation6 + $0x3d4] ss:$8 sps:$4 sm:$0xff]  }
 0x13e   :  { %903 = vmatprep.subr.bf16.mxu1 %v1922_v34  ;;  %v1992_v34 = vld [vmem:[#allocation6 + $0x3d0] ss:$8 sps:$4 sm:$0xff]  }
 0x141   :  { %904 = vmatpush1.bf16.msra.mxu1 %v1920_v35  ;;  %v1627_v35 = vld [vmem:[%s2300_s4 + $0x2] sm:$0x3] }
 0x142   :  { %905 = vmatprep.subr.bf16.mxu1 %v1925_v36  ;;  %v475_v36 = vrot.slane %v1627_v35, %v2256_v5 }
 0x145   :  { %906 = vmatpush1.bf16.msra.mxu1 %v1923_v37  ;;  %v479_v37 = vrot.slane %v1627_v35, %v2261_v7  ;;  %v2049_v35 = vld [vmem:[#allocation7 + $0x40] sm:$0xff]  }
 0x146   :  { %907 = vmatprep.subr.bf16.mxu1 %v1928_v38 }
 0x149   :  { %908 = vmatpush1.bf16.msra.mxu1 %v1926_v39 }
 0x14a   :  { %909 = vmatprep.subr.bf16.mxu1 %v1931_v40 }
 0x14d   :  { %910 = vmatpush1.bf16.msra.mxu1 %v1929_v41 }
 0x14e   :  { %911 = vmatprep.subr.bf16.mxu1 %v1934_v42 }
 0x151   :  { %912 = vmatpush1.bf16.msra.mxu1 %v1932_v43 }
 0x152   :  { %913 = vmatprep.subr.bf16.mxu1 %v1937_v44 }
 0x155   :  { %914 = vmatpush1.bf16.msra.mxu1 %v1935_v45 }
 0x156   :  { %915 = vmatprep.subr.bf16.mxu1 %v1940_v46 }
 0x159   :  { %916 = vmatpush1.bf16.msra.mxu1 %v1938_v47 }
 0x15a   :  { %917 = vmatprep.subr.bf16.mxu1 %v1943_v48  ;;  %v1997_v48 = vld [vmem:[#allocation6 + $0x3e4] ss:$8 sps:$4 sm:$0xff]  }
 0x15d   :  { %918 = vmatpush1.bf16.msra.mxu1 %v1941_v49  ;;  %v1995_v49 = vld [vmem:[#allocation6 + $0x3e0] ss:$8 sps:$4 sm:$0xff]  }
 0x15e   :  { %919 = vmatprep.subr.bf16.mxu1 %v1946_v50  ;;  %v2000_v50 = vld [vmem:[#allocation6 + $0x3f4] ss:$8 sps:$4 sm:$0xff]  }
 0x161   :  { %920 = vmatpush1.bf16.msra.mxu1 %v1944_v51  ;;  %v1998_v51 = vld [vmem:[#allocation6 + $0x3f0] ss:$8 sps:$4 sm:$0xff]  }
 0x162   :  { %921 = vmatprep.subr.bf16.mxu1 %v1949_v1  ;;  %v2019_v1 = vld [vmem:[#allocation6 + $0x460] ss:$8 sps:$4 sm:$0xff]  }
 0x165   :  { %922 = vmatpush1.bf16.msra.mxu1 %v1947_v2  ;;  %v2024_v2 = vld [vmem:[#allocation6 + $0x474] ss:$8 sps:$4 sm:$0xff]  }
 0x166   :  { %923 = vmatprep.subr.bf16.mxu1 %v1952_v3  ;;  %v2022_v3 = vld [vmem:[#allocation6 + $0x470] ss:$8 sps:$4 sm:$0xff]  }
 0x169   :  { %924 = vmatpush1.bf16.msra.mxu1 %v1950_v4  ;;  %v2027_v4 = vld [vmem:[#allocation6 + $0x484] ss:$8 sps:$4 sm:$0xff]  }
 0x1ff   :  { %v425_v55 = vpop.f32.mrb[0].mxu1 }
 0x200   :  { %v426_v56 = vadd.f32 %v425_v55, %v224_v53  ;;  %v427_v57 = vpop.f32.mrb[1].mxu1  ;;  %v2003_v53 = vld [vmem:[#allocation6 + $0x404] ss:$8 sps:$4 sm:$0xff]   ;;  %v2004_v55 = vld [vmem:[#allocation6 + $0x410] ss:$8 sps:$4 sm:$0xff]  }
 0x201   :  { %v428_v58 = vadd.f32 %v427_v57, %v228_v54  ;;  %v429_v59 = vpop.f32.mrb[2].mxu1  ;;  %v2006_v54 = vld [vmem:[#allocation6 + $0x414] ss:$8 sps:$4 sm:$0xff]   ;;  %1395 = vmatprep.subr.bf16.mxu1 %v2003_v53  ;;  %v2007_v57 = vld [vmem:[#allocation6 + $0x420] ss:$8 sps:$4 sm:$0xff]  }
 0x202   :  { %v432_v60 = vmax.f32 %v426_v56, 0.0  ;;  %v430_v61 = vpop.f32.mrb[3].mxu1  ;;  %v2009_v56 = vld [vmem:[#allocation6 + $0x424] ss:$8 sps:$4 sm:$0xff]   ;;  %v2010_v59 = vld [vmem:[#allocation6 + $0x430] ss:$8 sps:$4 sm:$0xff]  }
 0x203   :  { %v433_v62 = vmax.f32 %v428_v58, 0.0  ;;  %v2012_v58 = vld [vmem:[#allocation6 + $0x434] ss:$8 sps:$4 sm:$0xff]   ;;  %v2013_v61 = vld [vmem:[#allocation6 + $0x440] ss:$8 sps:$4 sm:$0xff]  }
 0x204   :  { %v434_v0 = vpack.c.bf16 %v432_v60, %v432_v60  ;;  %v2015_v60 = vld [vmem:[#allocation6 + $0x444] ss:$8 sps:$4 sm:$0xff]  }
 0x205   :  { %v435_v63 = vpack.c.bf16 %v433_v62, %v433_v62  ;;  %v2018_v62 = vld [vmem:[#allocation6 + $0x454] ss:$8 sps:$4 sm:$0xff]  }
 0x207   :  { %674 = vmatprep.mubr.bf16.mxu0 %v435_v63  ;;  %v2016_v63 = vld [vmem:[#allocation6 + $0x450] ss:$8 sps:$4 sm:$0xff]  }
 0x208   :  { %675 = vmatmul.mubr.bf16.vlgmr.msra.gmra.mrb[4].mxu0 %v434_v0  ;;  %v2021_v0 = vld [vmem:[#allocation6 + $0x464] ss:$8 sps:$4 sm:$0xff]  }
 0x209   :  { %1145 = vmatpush1.bf16.msra.mxu0 %v1953_v6  ;;  %v2025_v6 = vld [vmem:[#allocation6 + $0x480] ss:$8 sps:$4 sm:$0xff]  }
 0x20a   :  { %1146 = vmatprep.subr.bf16.mxu0 %v1958_v9  ;;  %v2028_v9 = vld [vmem:[#allocation6 + $0x490] ss:$8 sps:$4 sm:$0xff]  }
 0x20d   :  { %1147 = vmatpush1.bf16.msra.mxu0 %v1956_v10  ;;  %v2033_v10 = vld [vmem:[#allocation6 + $0x4a4] ss:$8 sps:$4 sm:$0xff]  }
 0x20e   :  { %1148 = vmatprep.subr.bf16.mxu0 %v1961_v11  ;;  %v2031_v11 = vld [vmem:[#allocation6 + $0x4a0] ss:$8 sps:$4 sm:$0xff]  }
 0x211   :  { %1149 = vmatpush1.bf16.msra.mxu0 %v1959_v12  ;;  %v2036_v12 = vld [vmem:[#allocation6 + $0x4b4] ss:$8 sps:$4 sm:$0xff]  }
 0x212   :  { %1150 = vmatprep.subr.bf16.mxu0 %v1964_v13  ;;  %v2034_v13 = vld [vmem:[#allocation6 + $0x4b0] ss:$8 sps:$4 sm:$0xff]  }
 0x215   :  { %1151 = vmatpush1.bf16.msra.mxu0 %v1962_v14  ;;  %v2039_v14 = vld [vmem:[#allocation6 + $0x4c4] ss:$8 sps:$4 sm:$0xff]  }
 0x216   :  { %1152 = vmatprep.subr.bf16.mxu0 %v1967_v15  ;;  %v2037_v15 = vld [vmem:[#allocation6 + $0x4c0] ss:$8 sps:$4 sm:$0xff]  }
 0x219   :  { %1153 = vmatpush1.bf16.msra.mxu0 %v1965_v16  ;;  %v2042_v16 = vld [vmem:[#allocation6 + $0x4d4] ss:$8 sps:$4 sm:$0xff]  }
 0x21a   :  { %1154 = vmatprep.subr.bf16.mxu0 %v1970_v17  ;;  %v2040_v17 = vld [vmem:[#allocation6 + $0x4d0] ss:$8 sps:$4 sm:$0xff]  }
 0x21d   :  { %1155 = vmatpush1.bf16.msra.mxu0 %v1968_v18  ;;  %v1660_v18 = vld [vmem:[%s2300_s4 + $0x4] sm:$0x3] }
 0x21e   :  { %1156 = vmatprep.subr.bf16.mxu0 %v1973_v19  ;;  %v726_v19 = vrot.slane %v1660_v18, %v2256_v5 }
 0x221   :  { %1157 = vmatpush1.bf16.msra.mxu0 %v1971_v20  ;;  %v730_v20 = vrot.slane %v1660_v18, %v2261_v7 }
 0x222   :  { %1158 = vmatprep.subr.bf16.mxu0 %v1976_v21 }
 0x225   :  { %1159 = vmatpush1.bf16.msra.mxu0 %v1974_v22 }
 0x226   :  { %1160 = vmatprep.subr.bf16.mxu0 %v1979_v23 }
 0x229   :  { %1161 = vmatpush1.bf16.msra.mxu0 %v1977_v24 }
 0x22a   :  { %1162 = vmatprep.subr.bf16.mxu0 %v1982_v25 }
 0x22d   :  { %1163 = vmatpush1.bf16.msra.mxu0 %v1980_v26 }
 0x22e   :  { %1164 = vmatprep.subr.bf16.mxu0 %v1985_v27 }
 0x231   :  { %1165 = vmatpush1.bf16.msra.mxu0 %v1983_v28 }
 0x232   :  { %1166 = vmatprep.subr.bf16.mxu0 %v1988_v29 }
 0x235   :  { %1167 = vmatpush1.bf16.msra.mxu0 %v1986_v30 }
 0x236   :  { %1168 = vmatprep.subr.bf16.mxu0 %v1991_v31  ;;  %v2045_v31 = vld [vmem:[#allocation6 + $0x4e4] ss:$8 sps:$4 sm:$0xff]  }
 0x239   :  { %1169 = vmatpush1.bf16.msra.mxu0 %v1989_v32  ;;  %v2043_v32 = vld [vmem:[#allocation6 + $0x4e0] ss:$8 sps:$4 sm:$0xff]  }
 0x23a   :  { %1170 = vmatprep.subr.bf16.mxu0 %v1994_v33  ;;  %v2048_v33 = vld [vmem:[#allocation6 + $0x4f4] ss:$8 sps:$4 sm:$0xff]  }
 0x23d   :  { %1171 = vmatpush1.bf16.msra.mxu0 %v1992_v34  ;;  %v2046_v34 = vld [vmem:[#allocation6 + $0x4f0] ss:$8 sps:$4 sm:$0xff]  }
 0x23e   :  { %1172 = vmatprep.subr.bf16.mxu0 %v1997_v48 }
 0x241   :  { %1173 = vmatpush1.bf16.msra.mxu0 %v1995_v49 }
 0x242   :  { %1174 = vmatprep.subr.bf16.mxu0 %v2000_v50 }
 0x245   :  { %1175 = vmatpush1.bf16.msra.mxu0 %v1998_v51 }
 0x246   :  { %1776 = vmatprep.subr.bf16.mxu0 %v2049_v35 }
 0x2db   :  { %v676_v38 = vpop.f32.mrb[4].mxu0 }
 0x2dc   :  { %v677_v39 = vadd.f32 %v676_v38, %v475_v36  ;;  %v678_v40 = vpop.f32.mrb[5].mxu0  ;;  %v2050_v36 = vld [vmem:[#allocation7] sm:$0xff]   ;;  %v2052_v38 = vld [vmem:[#allocation7 + $0x8] sm:$0xff]  }
 0x2dd   :  { %v679_v41 = vadd.f32 %v678_v40, %v479_v37  ;;  %v680_v42 = vpop.f32.mrb[6].mxu0  ;;  %v2051_v37 = vld [vmem:[#allocation7 + $0x48] sm:$0xff]   ;;  %v2054_v40 = vld [vmem:[#allocation7 + $0x10] sm:$0xff]  }
 0x2de   :  { %v683_v43 = vmax.f32 %v677_v39, 0.0  ;;  %v681_v44 = vpop.f32.mrb[7].mxu0  ;;  %v2053_v39 = vld [vmem:[#allocation7 + $0x50] sm:$0xff]   ;;  %v2056_v42 = vld [vmem:[#allocation7 + $0x18] sm:$0xff]  }
 0x2df   :  { %v684_v45 = vmax.f32 %v679_v41, 0.0  ;;  %v2055_v41 = vld [vmem:[#allocation7 + $0x58] sm:$0xff]   ;;  %v2058_v44 = vld [vmem:[#allocation7 + $0x20] sm:$0xff]  }
 0x2e0   :  { %v685_v47 = vpack.c.bf16 %v683_v43, %v683_v43  ;;  %v2057_v43 = vld [vmem:[#allocation7 + $0x60] sm:$0xff]  }
 0x2e1   :  { %v686_v46 = vpack.c.bf16 %v684_v45, %v684_v45  ;;  %v2059_v45 = vld [vmem:[#allocation7 + $0x68] sm:$0xff]  }
 0x2e3   :  { %925 = vmatprep.mubr.bf16.mxu1 %v686_v46  ;;  %v2060_v46 = vld [vmem:[#allocation7 + $0x28] sm:$0xff]  }
 0x2e4   :  { %926 = vmatmul.mubr.bf16.vlgmr.msra.gmra.mrb[4].mxu1 %v685_v47  ;;  %v1693_v47 = vld [vmem:[%s2300_s4 + $0x6] sm:$0x3] }
 0x2e5   :  { %1396 = vmatpush1.bf16.msra.mxu1 %v2001_v52  ;;  %v977_v48 = vrot.slane %v1693_v47, %v2256_v5  ;;  %v981_v49 = vrot.slane %v1693_v47, %v2261_v7 }
 0x2e6   :  { %1397 = vmatprep.subr.bf16.mxu1 %v2006_v54 }
 0x2e9   :  { %1398 = vmatpush1.bf16.msra.mxu1 %v2004_v55 }
 0x2ea   :  { %1399 = vmatprep.subr.bf16.mxu1 %v2009_v56 }
 0x2ed   :  { %1400 = vmatpush1.bf16.msra.mxu1 %v2007_v57 }
 0x2ee   :  { %1401 = vmatprep.subr.bf16.mxu1 %v2012_v58 }
 0x2f1   :  { %1402 = vmatpush1.bf16.msra.mxu1 %v2010_v59 }
 0x2f2   :  { %1403 = vmatprep.subr.bf16.mxu1 %v2015_v60  ;;  %v2061_v60 = vld [vmem:[#allocation7 + $0x70] sm:$0xff]  }
 0x2f5   :  { %1404 = vmatpush1.bf16.msra.mxu1 %v2013_v61  ;;  %v2062_v61 = vld [vmem:[#allocation7 + $0x30] sm:$0xff]  }
 0x2f6   :  { %1405 = vmatprep.subr.bf16.mxu1 %v2018_v62  ;;  %v2063_v62 = vld [vmem:[#allocation7 + $0x78] sm:$0xff]  }
 0x2f9   :  { %1406 = vmatpush1.bf16.msra.mxu1 %v2016_v63  ;;  %v2064_v63 = vld [vmem:[#allocation7 + $0x38] sm:$0xff]  }
 0x2fa   :  { %1407 = vmatprep.subr.bf16.mxu1 %v2021_v0  ;;  %v1726_v0 = vld [vmem:[%s2300_s4 + $0x8] sm:$0x3] }
 0x2fd   :  { %1408 = vmatpush1.bf16.msra.mxu1 %v2019_v1  ;;  %v1228_v1 = vrot.slane %v1726_v0, %v2256_v5 }
 0x2fe   :  { %1409 = vmatprep.subr.bf16.mxu1 %v2024_v2  ;;  %v1232_v2 = vrot.slane %v1726_v0, %v2261_v7 }
 0x301   :  { %1410 = vmatpush1.bf16.msra.mxu1 %v2022_v3 }
 0x302   :  { %1411 = vmatprep.subr.bf16.mxu1 %v2027_v4 }
 0x305   :  { %1412 = vmatpush1.bf16.msra.mxu1 %v2025_v6 }
 0x306   :  { %1413 = vmatprep.subr.bf16.mxu1 %v2030_v8 }
 0x309   :  { %1414 = vmatpush1.bf16.msra.mxu1 %v2028_v9 }
 0x30a   :  { %1415 = vmatprep.subr.bf16.mxu1 %v2033_v10 }
 0x30d   :  { %1416 = vmatpush1.bf16.msra.mxu1 %v2031_v11 }
 0x30e   :  { %1417 = vmatprep.subr.bf16.mxu1 %v2036_v12 }
 0x311   :  { %1418 = vmatpush1.bf16.msra.mxu1 %v2034_v13 }
 0x312   :  { %1419 = vmatprep.subr.bf16.mxu1 %v2039_v14 }
 0x315   :  { %1420 = vmatpush1.bf16.msra.mxu1 %v2037_v15 }
 0x316   :  { %1421 = vmatprep.subr.bf16.mxu1 %v2042_v16  ;;  %v1759_v16 = vld [vmem:[%s2302_s6] ss:$0 sm:$0xff] }
 0x319   :  { %1422 = vmatpush1.bf16.msra.mxu1 %v2040_v17 }
 0x31a   :  { %1423 = vmatprep.subr.bf16.mxu1 %v2045_v31 }
 0x31d   :  { %1424 = vmatpush1.bf16.msra.mxu1 %v2043_v32 }
 0x31e   :  { %1425 = vmatprep.subr.bf16.mxu1 %v2048_v33 }
 0x321   :  { %1426 = vmatpush1.bf16.msra.mxu1 %v2046_v34 }
 0x3b7   :  { %v927_v21 = vpop.f32.mrb[4].mxu1 }
 0x3b8   :  { %v928_v22 = vadd.f32 %v927_v21, %v726_v19  ;;  %v929_v23 = vpop.f32.mrb[5].mxu1 }
 0x3b9   :  { %v930_v24 = vadd.f32 %v929_v23, %v730_v20  ;;  %v931_v25 = vpop.f32.mrb[6].mxu1 }
 0x3ba   :  { %v934_v26 = vmax.f32 %v928_v22, 0.0  ;;  %v932_v27 = vpop.f32.mrb[7].mxu1 }
 0x3bb   :  { %v935_v28 = vmax.f32 %v930_v24, 0.0 }
 0x3bc   :  { %v936_v30 = vpack.c.bf16 %v934_v26, %v934_v26 }
 0x3bd   :  { %v937_v29 = vpack.c.bf16 %v935_v28, %v935_v28 }
 0x3bf   :  { %1176 = vmatprep.mubr.bf16.mxu0 %v937_v29 }
 0x3c0   :  { %1177 = vmatmul.mubr.bf16.vlgmr.msra.gmra.mrb[8].mxu0 %v936_v30 }
 0x3c1   :  { %1777 = vmatpush3.bf16.msra.mxu0 %v2050_v36 }
 0x3c2   :  { %1778 = vmatprep.subr.bf16.mxu0 %v2051_v37 }
 0x3c5   :  { %1779 = vmatpush3.bf16.msra.mxu0 %v2052_v38 }
 0x3c6   :  { %1780 = vmatprep.subr.bf16.mxu0 %v2053_v39 }
 0x3c9   :  { %1781 = vmatpush3.bf16.msra.mxu0 %v2054_v40 }
 0x3ca   :  { %1782 = vmatprep.subr.bf16.mxu0 %v2055_v41 }
 0x3cd   :  { %1783 = vmatpush3.bf16.msra.mxu0 %v2056_v42 }
 0x3ce   :  { %1784 = vmatprep.subr.bf16.mxu0 %v2057_v43 }
 0x3d1   :  { %1785 = vmatpush3.bf16.msra.mxu0 %v2058_v44 }
 0x3d2   :  { %1786 = vmatprep.subr.bf16.mxu0 %v2059_v45 }
 0x3d5   :  { %1787 = vmatpush3.bf16.msra.mxu0 %v2060_v46 }
 0x3d6   :  { %1788 = vmatprep.subr.bf16.mxu0 %v2061_v60 }
 0x3d9   :  { %1789 = vmatpush3.bf16.msra.mxu0 %v2062_v61 }
 0x3da   :  { %1790 = vmatprep.subr.bf16.mxu0 %v2063_v62 }
 0x3dd   :  { %1791 = vmatpush3.bf16.msra.mxu0 %v2064_v63 }
 0x493   :  { %v1178_v50 = vpop.f32.mrb[8].mxu0 }
 0x494   :  { %v1179_v51 = vadd.f32 %v1178_v50, %v977_v48  ;;  %v1180_v52 = vpop.f32.mrb[9].mxu0 }
 0x495   :  { %v1181_v53 = vadd.f32 %v1180_v52, %v981_v49  ;;  %v1182_v54 = vpop.f32.mrb[10].mxu0 }
 0x496   :  { %v1185_v55 = vmax.f32 %v1179_v51, 0.0  ;;  %v1183_v56 = vpop.f32.mrb[11].mxu0 }
 0x497   :  { %v1186_v57 = vmax.f32 %v1181_v53, 0.0 }
 0x498   :  { %v1187_v59 = vpack.c.bf16 %v1185_v55, %v1185_v55 }
 0x499   :  { %v1188_v58 = vpack.c.bf16 %v1186_v57, %v1186_v57 }
 0x49b   :  { %1427 = vmatprep.mubr.bf16.mxu1 %v1188_v58 }
 0x49c   :  { %1428 = vmatmul.mubr.bf16.vlgmr.msra.gmra.mrb[8].mxu1 %v1187_v59 }
 0x56f   :  { %v1429_v3 = vpop.f32.mrb[8].mxu1 }
 0x570   :  { %v1430_v4 = vadd.f32 %v1429_v3, %v1228_v1  ;;  %v1431_v6 = vpop.f32.mrb[9].mxu1 }
 0x571   :  { %v1432_v8 = vadd.f32 %v1431_v6, %v1232_v2  ;;  %v1433_v9 = vpop.f32.mrb[10].mxu1 }
 0x572   :  { %v1436_v10 = vmax.f32 %v1430_v4, 0.0  ;;  %v1434_v11 = vpop.f32.mrb[11].mxu1 }
 0x573   :  { %v1437_v12 = vmax.f32 %v1432_v8, 0.0 }
 0x574   :  { %v1438_v14 = vpack.c.bf16 %v1436_v10, %v1436_v10 }
 0x575   :  { %v1439_v13 = vpack.c.bf16 %v1437_v12, %v1437_v12 }
 0x577   :  { %1574 = vmatprep.mubr.bf16.mxu0 %v1439_v13 }
 0x578   :  { %1575 = vmatmul.mubr.bf16.vlgmr.msra.gmra.mrb[12].mxu0 %v1438_v14 }
 0x64b   :  { %v1792_v15 = vpop.f32.mrb[12].mxu0 }
 0x64c   :  { %v1793_v5 = vpop.f32.mrb[13].mxu0 }
 0x64d   :  { %v1794_v17 = vadd.f32 %v1793_v5, %v1792_v15  ;;  %v1795_v7 = vpop.f32.mrb[14].mxu0 }
 0x64e   :  { %v1796_v18 = vpop.f32.mrb[15].mxu0 }
 0x64f   :  { %v1577_v19 = vadd.f32 %v1794_v17, %v1759_v16 }
 0x651   :  { %1583 = vst.msk [vmem:[%s2303_s7] sm:$0xff] %vm1582_vm2, %v1577_v19 }
 0x652   :  { %1588 = vsyncpa [#allocation3], 1 }
 0x653   :  { %1589 = vsyncpa [#allocation5], 1 }
 0x654   :  { %1590 = vsyncpa [#allocation8], 1 }

</bundles_post_ra>
